<compile_context>
chip_gen: v6e
topology: v6e:2x2x1
jax: 0.10.0
libtpu: 0.0.40
codegen_flags: <defaults>
</compile_context>

<pallas_src>
import jax
import jax.numpy as jnp
from jax.experimental import pallas as pl
from jax.experimental.pallas import tpu as pltpu

ALPHA = 0.5
GAMMA = 2            # realized as (1-q)^2 in the kernel
LANE = 128
MAX_TM = 2048        # max sublane rows per block: 2048*128*4B = 1 MiB per input buffer
CLIP_LO = 1e-5
CLIP_HI = 0.99999


def _cdiv(a, b):
    return -(-a // b)


def _focal_sums_kernel(pred_ref, target_ref, out_ref):
    """Accumulate three lane-wise partial sums over one (tm, 128) block.

    out_ref is a resident (24, 128) f32 accumulator:
      rows  0: 8  sum over all elements of (1-q)^2 * log(q)   (q = prob of true class)
      rows  8:16  same sum restricted to positive (t==1) elements
      rows 16:24  sum of targets
    """
    i = pl.program_id(0)

    @pl.when(i == 0)
    def _init():
        out_ref[...] = jnp.zeros_like(out_ref)

    p = jnp.clip(pred_ref[...], CLIP_LO, CLIP_HI)
    t = target_ref[...]
    is_pos = t >= 0.5

    # Binary-target identity: one transcendental per element.
    # NOTE: assumes targets are {0, 1} (the standard use of this loss).
    q = jnp.where(is_pos, p, 1.0 - p)           # probability assigned to the true class
    one_m_q = 1.0 - q
    contrib = one_m_q * one_m_q * jnp.log(q)    # (1-q)^2 * log(q)
    pos_contrib = jnp.where(is_pos, contrib, 0.0)

    tm = p.shape[0]

    def fold(x):
        # (tm, 128) -> (8, 128) using whole-vreg adds only (VALU); the 8 -> 1
        # sublane reduce is done once in the JAX epilogue.
        return jnp.sum(x.reshape(tm // 8, 8, LANE), axis=0)

    out_ref[0:8, :] += fold(contrib)
    out_ref[8:16, :] += fold(pos_contrib)
    out_ref[16:24, :] += fold(t)


def focal_loss_pallas(pred, target):
    pred_f = pred.reshape(-1).astype(jnp.float32)
    target_f = target.reshape(-1).astype(jnp.float32)
    n = pred_f.shape[0]

    rows = n // LANE
    rem = n - rows * LANE

    if n >= 8 * LANE and rem == 0:
        # Common case: a contiguous reshape only -- zero extra HBM traffic.
        pred2 = pred_f.reshape(rows, LANE)
        targ2 = target_f.reshape(rows, LANE)
    elif n >= 8 * LANE:
        # 128-unaligned n: pad only the last partial row with neutral values
        # (p = clip-min -> ~1e-15 contribution per padded element, t = 0).
        # TODO(synk): this path still pays one extra copy for unaligned sizes.
        pad = LANE - rem
        pred2 = jnp.pad(pred_f, (0, pad), constant_values=CLIP_LO).reshape(rows + 1, LANE)
        targ2 = jnp.pad(target_f, (0, pad), constant_values=0.0).reshape(rows + 1, LANE)
        rows = rows + 1
    else:
        # Tiny input (< 1024 elements): pad up to a single (8, 128) block.
        pad = 8 * LANE - n
        pred2 = jnp.pad(pred_f, (0, pad), constant_values=CLIP_LO).reshape(8, LANE)
        targ2 = jnp.pad(target_f, (0, pad), constant_values=0.0).reshape(8, LANE)
        rows = 8

    # Evenly sized blocks (multiple of 8 rows) covering the largest possible head;
    # the few leftover rows (< one block) go to the plain-JAX tail below.
    steps = _cdiv(rows, MAX_TM)
    tm = min(MAX_TM, (rows // steps) // 8 * 8)
    head_rows = steps * tm

    in_spec = pl.BlockSpec((tm, LANE), lambda i: (i, 0))

    out = pl.pallas_call(
        _focal_sums_kernel,
        out_shape=jax.ShapeDtypeStruct((24, LANE), jnp.float32),
        grid_spec=pltpu.PrefetchScalarGridSpec(
            num_scalar_prefetch=0,
            grid=(steps,),
            in_specs=[in_spec, in_spec],
            out_specs=pl.BlockSpec((24, LANE), lambda i: (0, 0)),
        ),
        compiler_params=pltpu.CompilerParams(
            dimension_semantics=("arbitrary",),
        ),
    )(pred2, targ2)

    # Final 8x128 -> scalar reduction, once, in plain JAX.
    sum_all = jnp.sum(out[0:8])     # sum over every element of (1-q)^2 log q
    sum_pos = jnp.sum(out[8:16])    # positive-class part
    sum_t = jnp.sum(out[16:24])     # sum of targets

    # Plain-JAX tail for the few rows the grid does not cover (exact two-log formula).
    if head_rows < rows:
        tp = jnp.clip(pred2[head_rows:], CLIP_LO, CLIP_HI)
        tt = targ2[head_rows:]
        pos_tail = jnp.sum(tt * (1.0 - tp) * (1.0 - tp) * jnp.log(tp))
        neg_tail = jnp.sum((1.0 - tt) * tp * tp * jnp.log(1.0 - tp))
        sum_pos = sum_pos + pos_tail
        sum_all = sum_all + pos_tail + neg_tail
        sum_t = sum_t + jnp.sum(tt)

    s0 = sum_pos               # sum t*(1-p)^2*log(p)
    s1 = sum_all - sum_pos     # sum (1-t)*p^2*log(1-p)

    col0 = -ALPHA * s0
    col1 = -(1.0 - ALPHA) * s1
    n0 = ALPHA * sum_t
    n1 = (1.0 - ALPHA) * (n - sum_t)

    safe_n0 = jnp.where(n0 == 0.0, 1.0, n0)
    safe_n1 = jnp.where(n1 == 0.0, 1.0, n1)
    loss_if = col1 / safe_n1
    loss_else = col0 / safe_n0 + col1 / safe_n1
    return jnp.where(n0 == 0.0, loss_if, loss_else)


def focal_loss_ref(pred, target):
    # Pure-JAX transcription of the PyTorch forward for validation.
    pred = pred.reshape(-1, 1).astype(jnp.float32)
    target = target.reshape(-1, 1).astype(jnp.float32)
    pred = jnp.clip(pred, CLIP_LO, CLIP_HI)
    pred_cat = jnp.concatenate([jnp.log(pred), jnp.log(1.0 - pred)], axis=1)
    pt = jnp.concatenate([1.0 - pred, pred], axis=1)
    target_cat = jnp.concatenate(
        [ALPHA * target, (1.0 - ALPHA) * (1.0 - target)], axis=1
    )
    batch_loss = -1.0 * (target_cat * jnp.power(pt, GAMMA) * pred_cat)
    bls = batch_loss.sum(axis=0)
    tn = target_cat.sum(axis=0)
    safe_tn = jnp.where(tn == 0.0, 1.0, tn)
    loss_else = (bls / safe_tn).sum()
    loss_if = bls[1] / safe_tn[1]
    return jnp.where(tn[0] == 0.0, loss_if, loss_else)


if __name__ == "__main__":
    key = jax.random.PRNGKey(0)
    k1, k2 = jax.random.split(key)

    # Module takes probabilities (logits=False): pred in (0,1), binary target.
    x_shape = (2, 4, 16, 16)
    pred = jax.nn.sigmoid(jax.random.normal(k1, x_shape, jnp.float32))
    target = (jax.random.uniform(k2, x_shape) > 0.5).astype(jnp.float32)

    loss = jax.block_until_ready(focal_loss_pallas(pred, target))
    ref = jax.block_until_ready(focal_loss_ref(pred, target))

    assert jnp.allclose(loss, ref, rtol=1e-5, atol=1e-5), (loss, ref)
    print("KERNEL_OK")
</pallas_src>

<mosaic_0001>
module attributes {stable_mosaic.version = 11 : i64} {
  func.func @_focal_sums_kernel(%arg0: i32, %arg1: memref<16x128xf32, #tpu.memory_space<vmem>>, %arg2: memref<16x128xf32, #tpu.memory_space<vmem>>, %arg3: memref<24x128xf32, #tpu.memory_space<vmem>>) attributes {dimension_semantics = [#tpu.dimension_semantics<arbitrary>], iteration_bounds = array<i64: 1>, scalar_prefetch = 0 : i64, scratch_operands = 0 : i64, tpu.core_type = #tpu.core_type<tc>, window_params = [{transform_indices = @transform_0, window_bounds = array<i64: 16, 128>}, {transform_indices = @transform_1, window_bounds = array<i64: 16, 128>}, {pipeline_mode = #tpu.pipeline_mode<synchronous>, transform_indices = @transform_2, window_bounds = array<i64: 24, 128>}]} {
    %c0_i32 = arith.constant 0 : i32
    %0 = arith.cmpi eq, %arg0, %c0_i32 : i32
    %1 = arith.extui %0 : i1 to i32
    %c0_i32_0 = arith.constant 0 : i32
    %2 = arith.cmpi ne, %1, %c0_i32_0 : i32
    scf.if %2 {
      %cst_22 = arith.constant 0.000000e+00 : f32
      %36 = vector.broadcast %cst_22 : f32 to vector<24x128xf32>
      %c0_23 = arith.constant 0 : index
      %c0_24 = arith.constant 0 : index
      %37 = vector.load %arg3[%c0_23, %c0_24] : memref<24x128xf32, #tpu.memory_space<vmem>>, vector<24x128xf32>
      tpu.vector_store %arg3[%c0_23, %c0_24], %36 {strides = array<i32>} : memref<24x128xf32, #tpu.memory_space<vmem>>, vector<24x128xf32>,
    } else {
    }
    %c0 = arith.constant 0 : index
    %c0_1 = arith.constant 0 : index
    %3 = vector.load %arg1[%c0, %c0_1] : memref<16x128xf32, #tpu.memory_space<vmem>>, vector<16x128xf32>
    %cst = arith.constant 9.99999974E-6 : f32
    %cst_2 = arith.constant 0.999989986 : f32
    %4 = vector.broadcast %cst : f32 to vector<16x128xf32>
    %5 = arith.maximumf %4, %3 : vector<16x128xf32>
    %6 = vector.broadcast %cst_2 : f32 to vector<16x128xf32>
    %7 = arith.minimumf %6, %5 : vector<16x128xf32>
    %c0_3 = arith.constant 0 : index
    %c0_4 = arith.constant 0 : index
    %8 = vector.load %arg2[%c0_3, %c0_4] : memref<16x128xf32, #tpu.memory_space<vmem>>, vector<16x128xf32>
    %cst_5 = arith.constant 5.000000e-01 : f32
    %9 = vector.broadcast %cst_5 : f32 to vector<16x128xf32>
    %10 = arith.cmpf oge, %8, %9 : vector<16x128xf32>
    %cst_6 = arith.constant 1.000000e+00 : f32
    %11 = vector.broadcast %cst_6 : f32 to vector<16x128xf32>
    %12 = arith.subf %11, %7 : vector<16x128xf32>
    %13 = arith.select %10, %7, %12 : vector<16x128xi1>, vector<16x128xf32>
    %cst_7 = arith.constant 1.000000e+00 : f32
    %14 = vector.broadcast %cst_7 : f32 to vector<16x128xf32>
    %15 = arith.subf %14, %13 : vector<16x128xf32>
    %16 = arith.mulf %15, %15 : vector<16x128xf32>
    %17 = math.log %13 : vector<16x128xf32>
    %18 = arith.mulf %16, %17 : vector<16x128xf32>
    %cst_8 = arith.constant 0.000000e+00 : f32
    %19 = vector.broadcast %cst_8 : f32 to vector<16x128xf32>
    %20 = arith.select %10, %18, %19 : vector<16x128xi1>, vector<16x128xf32>
    %c0_9 = arith.constant 0 : index
    %c0_10 = arith.constant 0 : index
    %21 = vector.load %arg3[%c0_9, %c0_10] : memref<24x128xf32, #tpu.memory_space<vmem>>, vector<8x128xf32>
    %22 = vector.shape_cast %18 : vector<16x128xf32> to vector<2x8x128xf32>
    %cst_11 = arith.constant dense<0.000000e+00> : vector<8x128xf32>
    %23 = vector.multi_reduction <add>, %22, %cst_11 [0] : vector<2x8x128xf32> to vector<8x128xf32>
    %24 = arith.addf %21, %23 : vector<8x128xf32>
    %c0_12 = arith.constant 0 : index
    %c0_13 = arith.constant 0 : index
    %25 = vector.load %arg3[%c0_12, %c0_13] : memref<24x128xf32, #tpu.memory_space<vmem>>, vector<8x128xf32>
    tpu.vector_store %arg3[%c0_12, %c0_13], %24 {strides = array<i32>} : memref<24x128xf32, #tpu.memory_space<vmem>>, vector<8x128xf32>,
    %c8 = arith.constant 8 : index
    %c0_14 = arith.constant 0 : index
    %26 = vector.load %arg3[%c8, %c0_14] : memref<24x128xf32, #tpu.memory_space<vmem>>, vector<8x128xf32>
    %27 = vector.shape_cast %20 : vector<16x128xf32> to vector<2x8x128xf32>
    %cst_15 = arith.constant dense<0.000000e+00> : vector<8x128xf32>
    %28 = vector.multi_reduction <add>, %27, %cst_15 [0] : vector<2x8x128xf32> to vector<8x128xf32>
    %29 = arith.addf %26, %28 : vector<8x128xf32>
    %c8_16 = arith.constant 8 : index
    %c0_17 = arith.constant 0 : index
    %30 = vector.load %arg3[%c8_16, %c0_17] : memref<24x128xf32, #tpu.memory_space<vmem>>, vector<8x128xf32>
    tpu.vector_store %arg3[%c8_16, %c0_17], %29 {strides = array<i32>} : memref<24x128xf32, #tpu.memory_space<vmem>>, vector<8x128xf32>,
    %c16 = arith.constant 16 : index
    %c0_18 = arith.constant 0 : index
    %31 = vector.load %arg3[%c16, %c0_18] : memref<24x128xf32, #tpu.memory_space<vmem>>, vector<8x128xf32>
    %32 = vector.shape_cast %8 : vector<16x128xf32> to vector<2x8x128xf32>
    %cst_19 = arith.constant dense<0.000000e+00> : vector<8x128xf32>
    %33 = vector.multi_reduction <add>, %32, %cst_19 [0] : vector<2x8x128xf32> to vector<8x128xf32>
    %34 = arith.addf %31, %33 : vector<8x128xf32>
    %c16_20 = arith.constant 16 : index
    %c0_21 = arith.constant 0 : index
    %35 = vector.load %arg3[%c16_20, %c0_21] : memref<24x128xf32, #tpu.memory_space<vmem>>, vector<8x128xf32>
    tpu.vector_store %arg3[%c16_20, %c0_21], %34 {strides = array<i32>} : memref<24x128xf32, #tpu.memory_space<vmem>>, vector<8x128xf32>,
    return
  }
  func.func @transform_0(%arg0: i32) -> (i32, i32) {
    %c0_i32 = arith.constant 0 : i32
    %c0_i32_0 = arith.constant 0 : i32
    return %arg0, %c0_i32 : i32, i32
  }
  func.func @transform_1(%arg0: i32) -> (i32, i32) {
    %c0_i32 = arith.constant 0 : i32
    %c0_i32_0 = arith.constant 0 : i32
    return %arg0, %c0_i32 : i32, i32
  }
  func.func @transform_2(%arg0: i32) -> (i32, i32) {
    %c0_i32 = arith.constant 0 : i32
    %c0_i32_0 = arith.constant 0 : i32
    %c0_i32_1 = arith.constant 0 : i32
    return %c0_i32, %c0_i32_0 : i32, i32
  }
}

</mosaic_0001>

<bundles_post_ra>
// kernel: tpu_custom_call.1
= control target key start
LH: loop header
LB: loop body
LE: loop exit
PB: predicated region body
PF: predicated region fallthrough
CT: control target
= control target key end

     0   :  { %7 = vsyncpa [#allocation3], 0  ;;  %s221_s0 = inlined_call_operand.hbm [shape: f32[16,128], index: 0, kind: input, shape index: {}]   ;;  %s222_s1 = inlined_call_operand.hbm [shape: f32[16,128], index: 1, kind: input, shape index: {}]   ;;  %s223_s2 = inlined_call_operand.hbm [shape: f32[24,128], index: 2, kind: output, shape index: {}]  }
   0x1   :  { %8 = vsyncpa [#allocation6], 0 }
   0x2   :  { %9 = vsyncpa [#allocation4], 0  ;;  %s179_s9 = smov [#allocation2]  }
   0x3   :  { %s15_s10 = sshll.u32 %s179_s9, 4  ;;  %s16_s10 = int_to_ptr.vmem [resolvable:$true] %s15_s10 }
   0x4   :  { %s121_s11 = scalar_lea.vmem %s16_s10, 256  ;;  %p126_p1 = scmp.lt.s32.totalorder %s16_s10, %s16_s10 }
   0x5   :  { %p122_p0 = scmp.ne.s32.totalorder %s16_s10, %s121_s11  ;;  %p127_p2 = scmp.lt.s32.totalorder %s121_s11, %s121_s11 }
   0x7   :  { %p128_p3 = por %p127_p2, %p126_p1 }
   0x9   :  { %p129_p4 = pnand %p128_p3, %p122_p0 }
   0xb   :  { %132 = shalt.err (!%p129_p4)
}
   0xc   :  { %s180_s12 = smov 128   ;;  %s181_s13 = smov 8  }
   0xd   :  { %21 = dma.hbm_to_vmem [thread:$0]  %s221_s0, 256, %s16_s10, [#allocation3], %s180_s12, %s180_s12, %s181_s13  }
   0xe   :  { %s182_s16 = smov [#allocation5]  }
   0xf   :  { %s27_s17 = sshll.u32 %s182_s16, 4  ;;  %s28_s17 = int_to_ptr.vmem [resolvable:$true] %s27_s17 }
  0x10   :  { %s141_s18 = scalar_lea.vmem %s28_s17, 256  ;;  %p146_p6 = scmp.lt.s32.totalorder %s28_s17, %s28_s17 }
  0x11   :  { %p142_p5 = scmp.ne.s32.totalorder %s28_s17, %s141_s18  ;;  %p147_p7 = scmp.lt.s32.totalorder %s141_s18, %s141_s18 }
  0x13   :  { %p148_p8 = por %p147_p7, %p146_p6 }
  0x15   :  { %p149_p9 = pnand %p148_p8, %p142_p5 }
  0x17   :  { %152 = shalt.err (!%p149_p9)
}
  0x18   :  { %33 = dma.hbm_to_vmem [thread:$0]  %s222_s1, 256, %s28_s17, [#allocation6], %s180_s12, %s180_s12, %s181_s13  }
  0x19   :  { %173 = dma.done.wait [#allocation3], 256  }
  0x1a   :  { %174 = vsyncadd [#allocation3], 4294967040 }
  0x1b   :  { %175 = dma.done.wait [#allocation6], 256  }
  0x1c   :  { %176 = vsyncadd [#allocation6], 4294967040  ;;  %v47_v0 = vld [vmem:[#allocation2] sm:$0xff]  ;;  %v48_v1 = vld [vmem:[#allocation2 + $0x8] sm:$0xff]  ;;  %s183_s0 = smov [#allocation7]  }
  0x1d   :  { %v49_v2 = vmax.f32 %v47_v0, 1e-05  ;;  %v50_v3 = vmax.f32 %v48_v1, 1e-05  ;;  %v53_v4 = vld [vmem:[#allocation5] sm:$0xff]  ;;  %v54_v5 = vld [vmem:[#allocation5 + $0x8] sm:$0xff] }
  0x1e   :  { %v82_v6 = vadd.f32 %v54_v5, %v53_v4  ;;  %vm55_vm0 = vcmp.ge.f32.partialorder %v53_v4, 0.5  ;;  %vm56_vm1 = vcmp.ge.f32.partialorder %v54_v5, 0.5  ;;  %s90_s1 = sshll.u32 %s183_s0, 4  ;;  %s91_s1 = int_to_ptr.vmem [resolvable:$true] %s90_s1 }
  0x1f   :  { %v51_v7 = vmin.f32 %v49_v2, 0.99999  ;;  %v52_v8 = vmin.f32 %v50_v3, 0.99999  ;;  %s153_s21 = scalar_lea.vmem %s91_s1, 384  ;;  %p158_p11 = scmp.lt.s32.totalorder %s91_s1, %s91_s1 }
  0x20   :  { %84 = vst [vmem:[#allocation7 + $0x10] sm:$0xff] %v82_v6  ;;  %p154_p10 = scmp.ne.s32.totalorder %s91_s1, %s153_s21  ;;  %p159_p12 = scmp.lt.s32.totalorder %s153_s21, %s153_s21 }
  0x21   :  { %v57_v9 = vsub.f32 1.0, %v51_v7  ;;  %v58_v10 = vsub.f32 1.0, %v52_v8 }
  0x22   :  { %p160_p13 = por %p159_p12, %p158_p11 }
  0x23   :  { %v59_v11 = vsel %vm55_vm0, %v51_v7, %v57_v9  ;;  %v60_v12 = vsel %vm56_vm1, %v52_v8, %v58_v10 }
  0x24   :  { %109 = vlog2.f32 %v59_v11  ;;  %v61_v13 = vsub.f32 1.0, %v59_v11  ;;  %v62_v14 = vsub.f32 1.0, %v60_v12  ;;  %p161_p0 = pnand %p160_p13, %p154_p10 }
  0x25   :  { %111 = vlog2.f32 %v60_v12 }
  0x26   :  { %v63_v15 = vmul.f32 %v61_v13, %v61_v13  ;;  %v64_v17 = vmul.f32 %v62_v14, %v62_v14 }
  0x31   :  { %v110_v16 = vpop.eup %109 }
  0x32   :  { %v112_v18 = vpop.eup %111  ;;  %v66_v19 = vmul.f32 0.6931472, %v110_v16 }
  0x33   :  { %v68_v20 = vmul.f32 0.6931472, %v112_v18 }
  0x34   :  { %v69_v21 = vmul.f32 %v66_v19, %v63_v15 }
  0x35   :  { %v70_v22 = vmul.f32 %v68_v20, %v64_v17 }
  0x36   :  { %v71_v23 = vsel %vm55_vm0, %v69_v21, 0.0 }
  0x37   :  { %v74_v24 = vadd.f32 %v70_v22, %v69_v21  ;;  %v72_v25 = vsel %vm56_vm1, %v70_v22, 0.0 }
  0x38   :  { %v78_v26 = vadd.f32 %v72_v25, %v71_v23 }
  0x39   :  { %76 = vst [vmem:[#allocation7] sm:$0xff] %v74_v24 }
  0x3a   :  { %80 = vst [vmem:[#allocation7 + $0x8] sm:$0xff] %v78_v26 }
  0x3b   :  { %164 = shalt.err (!%p161_p0)
}
  0x3c   :  { %96 = dma.vmem_to_hbm [thread:$0]  %s91_s1, 384, %s223_s2, [#allocation4], %s180_s12, %s180_s12, %s181_s13  }
  0x3d   :  { %177 = dma.done.wait [#allocation4], 384  }
  0x3e   :  { %178 = vsyncadd [#allocation4], 4294966912 }
  0x3f   :  { %100 = vsyncpa [#allocation3], 1 }
  0x40   :  { %101 = vsyncpa [#allocation6], 1 }
  0x41   :  { %102 = vsyncpa [#allocation4], 1 }

</bundles_post_ra>
